<compile_context>
chip_gen: v5e
topology: v5e:2x2
jax: 0.10.0
libtpu: 0.0.40
codegen_flags: <defaults>
</compile_context>

<pallas_src>
import functools

import jax
import jax.numpy as jnp
from jax.experimental import pallas as pl
from jax.experimental.pallas import tpu as pltpu


# ---------------------------------------------------------------------------
# Kernel: fused, single-pass, weighted per-channel error accumulation.
# Static config (per-channel scales, channel alignment, tail info) is baked in.
# ---------------------------------------------------------------------------
def _combined_losses_kernel(yp_ref, yt_ref, o_ref, *,
                            sq_scales, abs_scales, true_perm, needs_perm,
                            hw, tile, mask_tail):
    s = pl.program_id(1)

    # Zero the per-sample accumulator block at the start of the reduction axis.
    @pl.when(s == 0)
    def _():
        o_ref[...] = jnp.zeros_like(o_ref)

    yp = yp_ref[...].astype(jnp.float32)          # (1, C, TILE)
    yt = yt_ref[...].astype(jnp.float32)          # (1, C_true, TILE)

    if needs_perm:
        # Align true channels to pred channels with static slices + concat
        # (only emitted when the channel maps differ; toy config skips this).
        yt = jnp.concatenate([yt[:, c:c + 1, :] for c in true_perm], axis=1)

    d = yp - yt                                   # (1, C, TILE)

    # Per-channel static scales (weight / (count * n_losses)); one of
    # sq/abs is zero for each channel, uncovered channels are all-zero.
    ch = jax.lax.broadcasted_iota(jnp.int32, d.shape, 1)
    sq = jnp.zeros(d.shape, jnp.float32)
    ab = jnp.zeros(d.shape, jnp.float32)
    for c in range(len(sq_scales)):
        if sq_scales[c] != 0.0:
            sq = jnp.where(ch == c, jnp.float32(sq_scales[c]), sq)
        if abs_scales[c] != 0.0:
            ab = jnp.where(ch == c, jnp.float32(abs_scales[c]), ab)

    contrib = sq * (d * d) + ab * jnp.abs(d)

    if mask_tail:
        # Last spatial tile extends past H*W: mask out-of-range lanes.
        lane = jax.lax.broadcasted_iota(jnp.int32, d.shape, 2)
        valid = (s * tile + lane) < hw
        contrib = jnp.where(valid, contrib, jnp.float32(0.0))

    # Pure VPU accumulation; cross-lane reduction is deferred to the wrapper.
    o_ref[...] += contrib


# ---------------------------------------------------------------------------
# Wrapper: free NCHW -> (N, C, H*W) reshape + pipelined pallas_call.
# ---------------------------------------------------------------------------
def combined_losses(y_pred, y_true, *, losses, y_pred_channels,
                    y_true_channels, weigh_losses=None):
    n_losses = len(y_pred_channels)
    if weigh_losses is None:
        weigh_losses = (1.0,) * n_losses
    # Guard against silent zip-truncation on config length mismatch.
    assert len(losses) == n_losses
    assert len(y_true_channels) == n_losses
    assert len(weigh_losses) == n_losses

    N, C, H, W = y_pred.shape
    Ct = y_true.shape[1]
    HW = H * W

    # Free, contiguous reshapes (no HBM transpose copies).
    yp3 = y_pred.reshape(N, C, HW)
    yt3 = y_true.reshape(N, Ct, HW)

    # ---- Build static per-channel tables (fold weight, count, 1/n_losses).
    sq_scales = [0.0] * C
    abs_scales = [0.0] * C
    true_of_pred = list(range(C))
    for idx in range(n_losses):
        p_sl = y_pred_channels[idx]
        t_sl = y_true_channels[idx]
        assert isinstance(p_sl, slice), "only slice y_pred_channels supported"
        # TODO(synk): tuple-of-int y_true_channels (torch.cat branch) not implemented.
        assert isinstance(t_sl, slice), "only slice y_true_channels supported"
        pr = list(range(*p_sl.indices(C)))
        tr = list(range(*t_sl.indices(Ct)))
        assert len(pr) == len(tr) and len(pr) > 0
        count = N * len(pr) * HW
        scale = float(weigh_losses[idx]) / (count * n_losses)
        name = losses[idx]
        for pc, tc in zip(pr, tr):
            true_of_pred[pc] = tc
            if name == "mse":
                sq_scales[pc] += scale
            elif name == "l1":
                abs_scales[pc] += scale
            else:
                raise NotImplementedError(name)
    needs_perm = true_of_pred != list(range(C))

    # ---- Spatial tiling (lane-dense; v7x-safe tile sizes — tiles are tiny).
    if HW <= 2048:
        TILE = HW                       # full-extent lane block (always legal)
    else:
        TILE = 2048                     # multiple of 128; ragged tail masked
    num_tiles = pl.cdiv(HW, TILE)
    mask_tail = (HW % TILE) != 0

    kernel = functools.partial(
        _combined_losses_kernel,
        sq_scales=tuple(sq_scales), abs_scales=tuple(abs_scales),
        true_perm=tuple(true_of_pred), needs_perm=needs_perm,
        hw=HW, tile=TILE, mask_tail=mask_tail)

    itemsize = jnp.dtype(y_pred.dtype).itemsize
    bytes_accessed = (N * C * HW + N * Ct * HW) * itemsize + N * C * TILE * 4
    flops = 6 * N * C * HW

    partials = pl.pallas_call(
        kernel,
        out_shape=jax.ShapeDtypeStruct((N, C, TILE), jnp.float32),
        grid=(N, num_tiles),
        in_specs=[
            pl.BlockSpec((1, C, TILE), lambda n, s: (n, 0, s)),
            pl.BlockSpec((1, Ct, TILE), lambda n, s: (n, 0, s)),
        ],
        # Output block index constant across the spatial axis -> resident
        # per-sample accumulator; distinct per n -> N axis can be "parallel".
        out_specs=pl.BlockSpec((1, C, TILE), lambda n, s: (n, 0, 0)),
        compiler_params=pltpu.CompilerParams(
            dimension_semantics=("parallel", "arbitrary"),
            vmem_limit_bytes=32 * 1024 * 1024),
        cost_estimate=pl.CostEstimate(
            flops=flops, transcendentals=0, bytes_accessed=bytes_accessed),
    )(yp3, yt3)

    # Tiny final cross-lane reduction of the per-sample partial vectors.
    return jnp.sum(partials)


# ---------------------------------------------------------------------------
# Pure-JAX reference (mirrors the PyTorch forward exactly).
# ---------------------------------------------------------------------------
def combined_losses_ref(y_pred, y_true, *, losses, y_pred_channels,
                        y_true_channels, weigh_losses=None):
    n = len(y_pred_channels)
    if weigh_losses is None:
        weigh_losses = (1.0,) * n
    loss = 0.0
    for idx in range(n):
        yp = y_pred[:, y_pred_channels[idx]].astype(jnp.float32)
        yt = y_true[:, y_true_channels[idx]].astype(jnp.float32)
        d = yp - yt
        if losses[idx] == "mse":
            loss = loss + weigh_losses[idx] * jnp.mean(d * d)
        elif losses[idx] == "l1":
            loss = loss + weigh_losses[idx] * jnp.mean(jnp.abs(d))
        else:
            raise NotImplementedError(losses[idx])
    return loss / n


if __name__ == "__main__":
    key = jax.random.PRNGKey(0)
    k1, k2 = jax.random.split(key)

    N, C, H, W = 2, 4, 16, 16
    y_pred = jax.random.normal(k1, (N, C, H, W), dtype=jnp.float32)
    y_true = jax.random.normal(k2, (N, C, H, W), dtype=jnp.float32)

    cfg = dict(
        losses=("mse", "l1"),
        y_pred_channels=(slice(0, 2), slice(2, 4)),
        y_true_channels=(slice(0, 2), slice(2, 4)),
        weigh_losses=(1.0, 0.5),
    )

    out = combined_losses(y_pred, y_true, **cfg)
    out = jax.block_until_ready(out)

    ref = combined_losses_ref(y_pred, y_true, **cfg)
    assert jnp.allclose(out, ref, rtol=1e-5, atol=1e-6), (out, ref)

    print("KERNEL_OK")
</pallas_src>

<mosaic_0001>
module attributes {stable_mosaic.version = 11 : i64} {
  func.func @_combined_losses_kernel(%arg0: i32, %arg1: i32, %arg2: memref<1x4x256xf32, #tpu.memory_space<vmem>>, %arg3: memref<1x4x256xf32, #tpu.memory_space<vmem>>, %arg4: memref<1x4x256xf32, #tpu.memory_space<vmem>>) attributes {dimension_semantics = [#tpu.dimension_semantics<parallel>, #tpu.dimension_semantics<arbitrary>], iteration_bounds = array<i64: 2, 1>, scalar_prefetch = 0 : i64, scratch_operands = 0 : i64, tpu.core_type = #tpu.core_type<tc>, window_params = [{transform_indices = @transform_0, window_bounds = array<i64: 1, 4, 256>}, {transform_indices = @transform_1, window_bounds = array<i64: 1, 4, 256>}, {transform_indices = @transform_2, window_bounds = array<i64: 1, 4, 256>}]} {
    %c0_i32 = arith.constant 0 : i32
    %0 = arith.cmpi eq, %arg1, %c0_i32 : i32
    %1 = arith.extui %0 : i1 to i32
    %c0_i32_0 = arith.constant 0 : i32
    %2 = arith.cmpi ne, %1, %c0_i32_0 : i32
    scf.if %2 {
      %cst_18 = arith.constant 0.000000e+00 : f32
      %33 = vector.broadcast %cst_18 : f32 to vector<1x4x256xf32>
      %c0_19 = arith.constant 0 : index
      %c0_20 = arith.constant 0 : index
      %c0_21 = arith.constant 0 : index
      %34 = vector.load %arg4[%c0_19, %c0_20, %c0_21] : memref<1x4x256xf32, #tpu.memory_space<vmem>>, vector<1x4x256xf32>
      tpu.vector_store %arg4[%c0_19, %c0_20, %c0_21], %33 {strides = array<i32>} : memref<1x4x256xf32, #tpu.memory_space<vmem>>, vector<1x4x256xf32>,
    } else {
    }
    %c0 = arith.constant 0 : index
    %c0_1 = arith.constant 0 : index
    %c0_2 = arith.constant 0 : index
    %3 = vector.load %arg2[%c0, %c0_1, %c0_2] : memref<1x4x256xf32, #tpu.memory_space<vmem>>, vector<1x4x256xf32>
    %c0_3 = arith.constant 0 : index
    %c0_4 = arith.constant 0 : index
    %c0_5 = arith.constant 0 : index
    %4 = vector.load %arg3[%c0_3, %c0_4, %c0_5] : memref<1x4x256xf32, #tpu.memory_space<vmem>>, vector<1x4x256xf32>
    %5 = arith.subf %3, %4 : vector<1x4x256xf32>
    %6 = tpu.iota {dimensions = array<i32: 1>} : vector<1x4x256xi32>
    %cst = arith.constant 0.000000e+00 : f32
    %7 = vector.broadcast %cst : f32 to vector<1x4x256xf32>
    %cst_6 = arith.constant 0.000000e+00 : f32
    %8 = vector.broadcast %cst_6 : f32 to vector<1x4x256xf32>
    %c0_i32_7 = arith.constant 0 : i32
    %9 = vector.broadcast %c0_i32_7 : i32 to vector<1x4x256xi32>
    %10 = arith.cmpi eq, %6, %9 : vector<1x4x256xi32>
    %cst_8 = arith.constant 4.8828125E-4 : f32
    %11 = vector.broadcast %cst_8 : f32 to vector<1x4x256xf32>
    %12 = arith.select %10, %11, %7 : vector<1x4x256xi1>, vector<1x4x256xf32>
    %c1_i32 = arith.constant 1 : i32
    %13 = vector.broadcast %c1_i32 : i32 to vector<1x4x256xi32>
    %14 = arith.cmpi eq, %6, %13 : vector<1x4x256xi32>
    %cst_9 = arith.constant 4.8828125E-4 : f32
    %15 = vector.broadcast %cst_9 : f32 to vector<1x4x256xf32>
    %16 = arith.select %14, %15, %12 : vector<1x4x256xi1>, vector<1x4x256xf32>
    %c2_i32 = arith.constant 2 : i32
    %17 = vector.broadcast %c2_i32 : i32 to vector<1x4x256xi32>
    %18 = arith.cmpi eq, %6, %17 : vector<1x4x256xi32>
    %cst_10 = arith.constant 2.44140625E-4 : f32
    %19 = vector.broadcast %cst_10 : f32 to vector<1x4x256xf32>
    %20 = arith.select %18, %19, %8 : vector<1x4x256xi1>, vector<1x4x256xf32>
    %c3_i32 = arith.constant 3 : i32
    %21 = vector.broadcast %c3_i32 : i32 to vector<1x4x256xi32>
    %22 = arith.cmpi eq, %6, %21 : vector<1x4x256xi32>
    %cst_11 = arith.constant 2.44140625E-4 : f32
    %23 = vector.broadcast %cst_11 : f32 to vector<1x4x256xf32>
    %24 = arith.select %22, %23, %20 : vector<1x4x256xi1>, vector<1x4x256xf32>
    %25 = arith.mulf %5, %5 : vector<1x4x256xf32>
    %26 = arith.mulf %16, %25 : vector<1x4x256xf32>
    %27 = math.absf %5 : vector<1x4x256xf32>
    %28 = arith.mulf %24, %27 : vector<1x4x256xf32>
    %29 = arith.addf %26, %28 : vector<1x4x256xf32>
    %c0_12 = arith.constant 0 : index
    %c0_13 = arith.constant 0 : index
    %c0_14 = arith.constant 0 : index
    %30 = vector.load %arg4[%c0_12, %c0_13, %c0_14] : memref<1x4x256xf32, #tpu.memory_space<vmem>>, vector<1x4x256xf32>
    %31 = arith.addf %30, %29 : vector<1x4x256xf32>
    %c0_15 = arith.constant 0 : index
    %c0_16 = arith.constant 0 : index
    %c0_17 = arith.constant 0 : index
    %32 = vector.load %arg4[%c0_15, %c0_16, %c0_17] : memref<1x4x256xf32, #tpu.memory_space<vmem>>, vector<1x4x256xf32>
    tpu.vector_store %arg4[%c0_15, %c0_16, %c0_17], %31 {strides = array<i32>} : memref<1x4x256xf32, #tpu.memory_space<vmem>>, vector<1x4x256xf32>,
    return
  }
  func.func @transform_0(%arg0: i32, %arg1: i32) -> (i32, i32, i32) {
    %c0_i32 = arith.constant 0 : i32
    %c0_i32_0 = arith.constant 0 : i32
    return %arg0, %c0_i32, %arg1 : i32, i32, i32
  }
  func.func @transform_1(%arg0: i32, %arg1: i32) -> (i32, i32, i32) {
    %c0_i32 = arith.constant 0 : i32
    %c0_i32_0 = arith.constant 0 : i32
    return %arg0, %c0_i32, %arg1 : i32, i32, i32
  }
  func.func @transform_2(%arg0: i32, %arg1: i32) -> (i32, i32, i32) {
    %c0_i32 = arith.constant 0 : i32
    %c0_i32_0 = arith.constant 0 : i32
    %c0_i32_1 = arith.constant 0 : i32
    return %arg0, %c0_i32, %c0_i32_0 : i32, i32, i32
  }
}

</mosaic_0001>

<bundles_post_ra>
// kernel: tpu_custom_call.1
= control target key start
LH: loop header
LB: loop body
LE: loop exit
PB: predicated region body
PF: predicated region fallthrough
CT: control target
= control target key end

     0   :  { %7 = vsyncpa [#allocation3], 0  ;;  %s782_s0 = inlined_call_operand.hbm [shape: f32[2,4,256], index: 0, kind: input, shape index: {}]   ;;  %s783_s1 = inlined_call_operand.hbm [shape: f32[2,4,256], index: 1, kind: input, shape index: {}]   ;;  %s784_s2 = inlined_call_operand.hbm [shape: f32[2,4,256], index: 2, kind: output, shape index: {}]  }
   0x1   :  { %9 = vsyncpa [#allocation3 + $0x1], 0 }
   0x2   :  { %10 = vsyncpa [#allocation6], 0 }
   0x3   :  { %12 = vsyncpa [#allocation6 + $0x1], 0 }
   0x4   :  { %13 = vsyncpa [#allocation4], 0 }
   0x5   :  { %15 = vsyncpa [#allocation4 + $0x1], 0  ;;  %s649_s9 = smov 0   ;;  %s651_s10 = smov 0  }
   0x6   :  { %s653_s11 = smov 0   ;;  %s655_s12 = smov 0  }
   0x7   :  { %s657_s13 = smov 0   ;;  %s659_s14 = smov 0  }
   0x8 LB: > { %s395_s15 = sadd.s32 4294967295, %s631_s14   ;;  %s396_s16 = sadd.s32 4294967294, %s631_s14   ;;  %s631_s14 = sphi %s659_s14, %s21_s14   ;;  %s627_s13 = sphi %s657_s13, %s793_s13   ;;  %s623_s12 = sphi %s655_s12, %s792_s12   ;;  %s619_s11 = sphi %s653_s11, %s791_s11   ;;  %s615_s10 = sphi %s651_s10, %s790_s10   ;;  %s611_s9 = sphi %s649_s9, %s789_s9  }
   0x9   : > { %s33_s17 = sadd.s32 1, %s627_s13  ;;  %s42_s18 = sadd.s32 1, %s619_s11 }
   0xa   : > { %p35_p0 = scmp.ge.s32.totalorder %s33_s17, 2  ;;  %p49_p1 = scmp.ne.s32.totalorder %s619_s11, %s615_s10 }
   0xb   : > { %p50_p2 = scmp.eq.s32.totalorder %s631_s14, 0  ;;  %p55_p3 = scmp.ne.s32.totalorder %s615_s10, %s611_s9 }
   0xc   : > { %s795_s17 = smov (%p35_p0, %s33_s17), 0  ;;  %p56_p5 = scmp.eq.s32.totalorder %s395_s15, 0 }
   0xd   : > { %p690_p4 = por %p50_p2, %p49_p1  ;;  %s37_s20 = ssub.s32 %s627_s13, %s795_s17 }
   0xe   : > { %p107_p6 = scmp.eq.s32.totalorder %s395_s15, 1  ;;  %p40_p7 = scmp.eq.s32.totalorder %s37_s20, 0 }
   0xf   : > { %p696_p8 = por %p56_p5, %p55_p3  ;;  %p113_p10 = scmp.eq.s32.totalorder %s396_s16, 1 }
  0x10   : > { %p700_p9 = por %p107_p6, %p49_p1  ;;  %p398_p12 = scmp.ge.s32.totalorder %s631_s14, 2 }
  0x11   : > { %s705_s23 = scalar_select %p40_p7, %s619_s11, %s42_s18  }
  0x12   : > { %p707_p11 = por %p113_p10, %p55_p3  ;;  %p434_p13 = scmp.lt.s32.totalorder %s631_s14, 2 }
  0x13   : > { %s133_s25 = sand.u32 1, %s619_s11   ;;  %s414_s27 = sshll.u32 %s627_s13, 3 }
  0x14   : > { %s399_s26 = sshll.u32 %s133_s25, 3  ;;  %s144_s30 = scalar_lea.hbm %s782_s0, %s414_s27 }
  0x15   : > { %s137_s3 = scalar_lea.vmem [#allocation2], %s399_s26  ;;  %s146_s5 = sshll.u32 %s144_s30, 4  ;;  %s147_s5 = int_to_ptr.hbm [resolvable:$true] %s146_s5 }
  0x16   : > { %s148_s4 = sshll.u32 %s137_s3, 4  ;;  %p424_p0 = pnand %p434_p13, %p690_p4  ;;  %s149_s4 = int_to_ptr.vmem [resolvable:$true] %s148_s4 }
  0x17   : > { %p405_p1 = scmp.ge.s32.totalorder %s631_s14, 1  ;;  %p175_p2 = scmp.lt.s32.totalorder %s631_s14, 3 }
  0x18   : > { %s134_s6 = scalar_lea.sflag [#allocation3], %s133_s25  ;;  %s166_s15 = scalar_lea.hbm %s783_s1, %s414_s27 }
  0x19   : > { %426 = dma.hbm_to_vmem [thread:$0]  (!%p424_p0), %s147_s5, 128, %s149_s4, %s134_s6  }
  0x1a   : > { %p176_p3 = pnand %p405_p1, %p175_p2  ;;  %s159_s16 = scalar_lea.vmem [#allocation5], %s399_s26 }
  0x1b   : > { %s170_s18 = sshll.u32 %s159_s16, 4  ;;  %s168_s20 = sshll.u32 %s166_s15, 4  ;;  %s171_s18 = int_to_ptr.vmem [resolvable:$true] %s170_s18  ;;  %s169_s20 = int_to_ptr.hbm [resolvable:$true] %s168_s20 }
  0x1c   : > { %s156_s28 = scalar_lea.sflag [#allocation6], %s133_s25  ;;  %179 = sbr.rel (%p176_p3) target bundleno = 67 (0x43), region = 28 }
  0x1d   : > { %429 = dma.hbm_to_vmem [thread:$0]  (!%p424_p0), %s169_s20, 128, %s171_s18, %s156_s28  }
  0x1e   : > { %s726_s19 = sand.u32 (!%p176_p3), 1, %s615_s10  }
  0x1f   : > { %s729_s29 = sshll.u32 (!%p176_p3), %s726_s19, 3  ;;  %s182_s30 = scalar_lea.sflag (!%p176_p3), [#allocation3], %s726_s19 }
  0x20   : > { %s185_s3 = scalar_lea.vmem (!%p176_p3), [#allocation2], %s729_s29 }
  0x21   : > { %598 = dma.done.wait (%p696_p8), %s182_s30, 128  }
  0x22   : > { %600 = vsyncadd (%p696_p8), %s182_s30, 4294967168  ;;  %s192_s25 = scalar_lea.sflag [#allocation6], %s726_s19  ;;  %s195_s26 = scalar_lea.vmem [#allocation5], %s729_s29 }
  0x23   : > { %602 = dma.done.wait (%p696_p8), %s192_s25, 128  }
  0x24   : > { %604 = vsyncadd (%p696_p8), %s192_s25, 4294967168  ;;  %v229_v0 = vld [vmem:[%s185_s3] sm:$0xff]  ;;  %v230_v1 = vld [vmem:[%s195_s26] sm:$0xff]  ;;  %v232_v4 = vlaneseq  ;;  %v633_v9 = vmov 0.0   ;;  %s416_s21 = sshll.u32 %s623_s12, 3  ;;  %vm266_vm4 = vcmask 1043456  }
  0x25   : > { %v231_v2 = vsub.f32 %v229_v0, %v230_v1  ;;  %s283_s5 = scalar_lea.hbm %s784_s2, %s416_s21  ;;  %s221_s6 = scalar_lea.vmem [#allocation7], %s729_s29 }
  0x26   : > { %v233_v5 = vshrl.u32 %v232_v4, 7  ;;  %s285_s7 = sshll.u32 %s221_s6, 4  ;;  %s287_s8 = sshll.u32 %s283_s5, 4  ;;  %s286_s7 = int_to_ptr.vmem [resolvable:$true] %s285_s7  ;;  %s288_s8 = int_to_ptr.hbm [resolvable:$true] %s287_s8 }
  0x27   : > { %v242_v3 = vmul.f32 %v231_v2, %v231_v2  ;;  %v251_v6 = vand.u32 2147483647, %v231_v2  ;;  %s272_s12 = scalar_lea.sflag [#allocation4], %s726_s19  ;;  %s559_s15 = sshra.s32 %s288_s8, 4  ;;  %s560_s15 = int_to_ptr.hbm [resolvable:$true] %s559_s15 }
  0x28   : > { %vm234_vm0 = vcmp.eq.s32.totalorder %v233_v5, 0  ;;  %vm238_vm1 = vcmp.eq.s32.totalorder %v233_v5, 2  ;;  %vm236_vm2 = vcmp.eq.s32.totalorder %v233_v5, 1  ;;  %vm240_vm3 = vcmp.eq.s32.totalorder %v233_v5, 3  ;;  %s561_s16 = scalar_lea.hbm %s560_s15, 8  ;;  %s565_s28 = scalar_lea.hbm %s784_s2, 16 }
  0x29   : > { %244 = vst [vmem:[#allocation1] ss:$2 sm:$0xff] %v242_v3  ;;  %v235_v10 = vsel %vm234_vm0, 0.00048828125, %v633_v9  ;;  %v239_v11 = vsel %vm238_vm1, 0.00024414063, %v633_v9  ;;  %p562_p4 = scmp.ne.s32.totalorder %s560_s15, %s561_s16  ;;  %p566_p7 = scmp.lt.s32.totalorder %s560_s15, %s784_s2 }
  0x2a   : > { %v237_v12 = vsel %vm236_vm2, 0.00048828125, %v235_v10  ;;  %v241_v13 = vsel %vm240_vm3, 0.00024414063, %v239_v11  ;;  %p567_p8 = scmp.lt.s32.totalorder %s565_s28, %s561_s16 }
  0x2b   : > { %p563_p5 = pnand %p562_p4, %p700_p9 }
  0x2c   : > { %p568_p10 = por %p567_p8, %p566_p7 }
  0x2d   : > { %p564_p6 = pneg %p563_p5 }
  0x2f   : > { %p569_p13 = pnand %p568_p10, %p564_p6 }
  0x30   : > { %v245_v7 = vld.sshfl [vmem:[#allocation1] sm:$0xff pattern:$0x75316420]  ;;  %v246_v8 = vld.sshfl [vmem:[#allocation1 + $0x8] sm:$0xff pattern:$0x75316420] }
  0x31   : > { %253 = vst [vmem:[#allocation1] ss:$2 sm:$0xff] %v251_v6  ;;  %v250_v16 = vmul.f32 %v246_v8, %v237_v12  ;;  %v249_v19 = vmul.f32 %v245_v7, %v237_v12 }
  0x38   : > { %v254_v14 = vld.sshfl [vmem:[#allocation1] sm:$0xff pattern:$0x75316420]  ;;  %v255_v15 = vld.sshfl [vmem:[#allocation1 + $0x8] sm:$0xff pattern:$0x75316420] }
  0x39   : > { %v258_v17 = vmul.f32 %v254_v14, %v241_v13  ;;  %v259_v18 = vmul.f32 %v255_v15, %v241_v13 }
  0x3b   : > { %v261_v20 = vadd.f32 %v259_v18, %v250_v16  ;;  %v260_v21 = vadd.f32 %v258_v17, %v249_v19 }
  0x3d   : > { %v265_v22 = vrot.slane %v261_v20, 4 }
  0x3f   : > { %v267_v23 = vsel %vm266_vm4, %v260_v21, %v265_v22 }
  0x40   : > { %270 = vst [vmem:[%s221_s6] sm:$0xff] %v267_v23 }
  0x41   : > { %572 = shalt.err (!%p569_p13)
}
  0x42   : > { %421 = dma.vmem_to_hbm [thread:$0]  (%p700_p9), %s286_s7, 128, %s288_s8, %s272_s12  }
  0x43 PF: > { %s299_s19 = sand.u32 1, %s611_s9   ;;  %p431_p0 = pnand %p398_p12, %p707_p11 }
  0x44   : > { %s300_s3 = scalar_lea.sflag [#allocation4], %s299_s19 }
  0x45   : > { %p432_p1 = pneg %p431_p0 }
  0x47   : > { %606 = dma.done.wait (%p432_p1), %s300_s3, 128  }
  0x48   : > { %608 = vsyncadd (%p432_p1), %s300_s3, 4294967168  ;;  %s21_s14 = sadd.s32 1, %s631_s14   ;;  %s789_s9 = smov %s615_s10 }
  0x49   : > { %p18_p2 = scmp.ge.s32.totalorder %s21_s14, 4   ;;  %s790_s10 = smov %s619_s11 }
  0x4a   : > { %s791_s11 = smov %s705_s23  ;;  %s792_s12 = smov %s627_s13 }
  0x4b   : > { %s793_s13 = smov %s795_s17  ;;  %20 = sbr.rel (!%p18_p2) target bundleno = 8 (0x8), region = 90 }
  0x50   :  { %306 = vsyncpa [#allocation3], 1 }
  0x51   :  { %308 = vsyncpa [#allocation3 + $0x1], 1 }
  0x52   :  { %309 = vsyncpa [#allocation6], 1 }
  0x53   :  { %311 = vsyncpa [#allocation6 + $0x1], 1 }
  0x54   :  { %312 = vsyncpa [#allocation4], 1 }
  0x55   :  { %314 = vsyncpa [#allocation4 + $0x1], 1 }

</bundles_post_ra>
